<compile_context>
chip_gen: v5e
topology: v5e:2x2
jax: 0.10.0
libtpu: 0.0.40
codegen_flags: <defaults>
</compile_context>

<pallas_src>
import math

import jax
import jax.numpy as jnp
from jax.experimental import pallas as pl
from jax.experimental.pallas import tpu as pltpu

HIDDEN1_UNITS = 300
HIDDEN2_UNITS = 600

# Lane-aligned padded widths used inside the kernel.
H1_PAD = 384     # 300 -> 3 x 128
H2_PAD = 640     # 600 -> 5 x 128
HEAD_PAD = 128   # head matmul width (only first 3 columns are real)
OUT_PAD = 8      # stored output width (block last dim == full array dim -> legal)


def _round_up(n, m):
    return ((n + m - 1) // m) * m


def _cdiv(a, b):
    return -(-a // b)


def actor_kernel(x_ref, w1_ref, b1_ref, w2_ref, b2_ref, wh_ref, bh_ref,
                 scale_ref, off_ref, o_ref):
    # Activations cast to bf16 at the MXU inputs; MXU accumulates in f32.
    x = x_ref[...].astype(jnp.bfloat16)

    # fc1: f32 accumulate, then bias-add + ReLU in bf16 (packed VALU on v6e/v7x).
    # Padded columns: relu(0 + 0) = 0, so the padded math is exact.
    h1 = jnp.dot(x, w1_ref[...], preferred_element_type=jnp.float32).astype(jnp.bfloat16)
    h1 = jnp.maximum(h1 + b1_ref[...], 0.0)

    # fc2: zero rows of W2 for the padded h1 columns contribute nothing.
    h2 = jnp.dot(h1, w2_ref[...], preferred_element_type=jnp.float32).astype(jnp.bfloat16)
    h2 = jnp.maximum(h2 + b2_ref[...], 0.0)

    # Fused heads (128-wide padded matmul); keep f32 for bias + epilogue.
    logits = jnp.dot(h2, wh_ref[...], preferred_element_type=jnp.float32)
    logits = logits[:, :OUT_PAD] + bh_ref[...]

    # Steering x2 pre-scale already folded into wh/bh column 0 at pack time:
    #   tanh(z) = 2*sigmoid(2z) - 1  ->  out = sigmoid(logits)*scale + offset
    # scale = [2,1,1,0,...], offset = [-1,0,0,0,...]  (padded cols become 0)
    out = jax.nn.sigmoid(logits) * scale_ref[...] + off_ref[...]
    o_ref[...] = out.astype(o_ref.dtype)


def actor_forward(x, packed_params, *, tb=1024):
    """x: (B, state_size) f32; packed_params: output of pack_params()."""
    w1, b1, w2, b2, wh, bh, scale, off = packed_params
    B, S = x.shape

    # Padding-aware batch tile: minimize padded rows for awkward B, and force
    # >=2 grid steps once the batch is big enough so the "parallel" axis can
    # shard across both v7x TensorCores.
    n_steps = _cdiv(B, int(tb))
    if B >= 128:
        n_steps = max(n_steps, 2)
    TB = max(8, _round_up(_cdiv(B, n_steps), 8))
    Bp = _round_up(B, TB)
    if Bp != B:
        x = jnp.pad(x, ((0, Bp - B), (0, 0)))
    grid = (Bp // TB,)

    # Constant block index => weights/biases stay VMEM-resident across grid steps.
    const_spec = lambda shape: pl.BlockSpec(shape, lambda i: (0, 0))

    param_bytes = sum(int(p.size) * p.dtype.itemsize for p in packed_params)
    cost = pl.CostEstimate(
        flops=2 * Bp * (S * H1_PAD + H1_PAD * H2_PAD + H2_PAD * HEAD_PAD),
        transcendentals=Bp * OUT_PAD,
        bytes_accessed=Bp * S * 4 + Bp * OUT_PAD * 4 + param_bytes,
    )

    out = pl.pallas_call(
        actor_kernel,
        out_shape=jax.ShapeDtypeStruct((Bp, OUT_PAD), jnp.float32),
        grid_spec=pltpu.PrefetchScalarGridSpec(
            num_scalar_prefetch=0,
            grid=grid,
            in_specs=[
                pl.BlockSpec((TB, S), lambda i: (i, 0)),   # x tile (pipelined)
                const_spec(w1.shape),                       # (S, 384)    bf16
                const_spec(b1.shape),                       # (1, 384)    bf16
                const_spec(w2.shape),                       # (384, 640)  bf16
                const_spec(b2.shape),                       # (1, 640)    bf16
                const_spec(wh.shape),                       # (640, 128)  bf16
                const_spec(bh.shape),                       # (1, 8)      f32
                const_spec(scale.shape),                    # (1, 8)      f32
                const_spec(off.shape),                      # (1, 8)      f32
            ],
            out_specs=pl.BlockSpec((TB, OUT_PAD), lambda i: (i, 0)),
        ),
        compiler_params=pltpu.CompilerParams(
            dimension_semantics=("parallel",),              # shard batch over TCs (v7x)
            vmem_limit_bytes=48 * 1024 * 1024,              # headroom for big TB on v5e
        ),
        cost_estimate=cost,
    )(x, w1, b1, w2, b2, wh, bh, scale, off)

    return out[:B, :3]


def init_params(key, state_size):
    """f32, unpadded params mirroring the PyTorch module's __init__ (x @ W + b layout)."""
    k1, k2, k3, k4, k5, k6, k7, k8, k9, k10 = jax.random.split(key, 10)

    def linear_init(kw, kb, fan_in, fan_out):
        # nn.Linear default: U(-1/sqrt(fan_in), 1/sqrt(fan_in)) for weight and bias
        bound = 1.0 / math.sqrt(fan_in)
        w = jax.random.uniform(kw, (fan_in, fan_out), jnp.float32, -bound, bound)
        b = jax.random.uniform(kb, (1, fan_out), jnp.float32, -bound, bound)
        return w, b

    w1, b1 = linear_init(k1, k2, state_size, HIDDEN1_UNITS)
    w2, b2 = linear_init(k3, k4, HIDDEN1_UNITS, HIDDEN2_UNITS)

    # heads: weight ~ Normal(0, 0.0001); bias keeps the default uniform init
    bound_h = 1.0 / math.sqrt(HIDDEN2_UNITS)
    w_steer = 0.0001 * jax.random.normal(k5, (HIDDEN2_UNITS, 1), jnp.float32)
    b_steer = jax.random.uniform(k6, (1, 1), jnp.float32, -bound_h, bound_h)
    w_accel = 0.0001 * jax.random.normal(k7, (HIDDEN2_UNITS, 1), jnp.float32)
    b_accel = jax.random.uniform(k8, (1, 1), jnp.float32, -bound_h, bound_h)
    w_brake = 0.0001 * jax.random.normal(k9, (HIDDEN2_UNITS, 1), jnp.float32)
    b_brake = jax.random.uniform(k10, (1, 1), jnp.float32, -bound_h, bound_h)

    wh = jnp.concatenate([w_steer, w_accel, w_brake], axis=1)  # (600, 3)
    bh = jnp.concatenate([b_steer, b_accel, b_brake], axis=1)  # (1, 3)
    return (w1, b1, w2, b2, wh, bh)


def pack_params(params):
    """Zero-pad to lane-aligned widths, cast weights (and hidden biases) to bf16,
    fold the x2 steering pre-scale into head column 0, and build the epilogue
    scale/offset rows."""
    w1, b1, w2, b2, wh, bh = params
    S = w1.shape[0]

    def pad2(a, rows, cols):
        return jnp.pad(a, ((0, rows - a.shape[0]), (0, cols - a.shape[1])))

    w1p = pad2(w1, S, H1_PAD).astype(jnp.bfloat16)
    b1p = pad2(b1, 1, H1_PAD).astype(jnp.bfloat16)
    w2p = pad2(w2, H1_PAD, H2_PAD).astype(jnp.bfloat16)
    b2p = pad2(b2, 1, H2_PAD).astype(jnp.bfloat16)

    # tanh(z) = 2*sigmoid(2z) - 1: fold the 2z into the steering column.
    wh2 = wh.at[:, 0].multiply(2.0)
    bh2 = bh.at[:, 0].multiply(2.0)
    whp = pad2(wh2, H2_PAD, HEAD_PAD).astype(jnp.bfloat16)
    bhp = pad2(bh2, 1, OUT_PAD)                                # f32, (1, 8)

    scale = jnp.array([[2.0, 1.0, 1.0] + [0.0] * (OUT_PAD - 3)], dtype=jnp.float32)
    off = jnp.array([[-1.0] + [0.0] * (OUT_PAD - 1)], dtype=jnp.float32)
    return (w1p, b1p, w2p, b2p, whp, bhp, scale, off)


def reference_forward(x, params):
    """Pure-JAX f32 reference matching the PyTorch forward."""
    w1, b1, w2, b2, wh, bh = params
    h1 = jnp.maximum(x @ w1 + b1, 0.0)
    h2 = jnp.maximum(h1 @ w2 + b2, 0.0)
    logits = h2 @ wh + bh
    return jnp.concatenate(
        [jnp.tanh(logits[:, :1]),
         jax.nn.sigmoid(logits[:, 1:2]),
         jax.nn.sigmoid(logits[:, 2:3])], axis=1)


if __name__ == "__main__":
    key = jax.random.PRNGKey(0)
    kx, kx2, kp = jax.random.split(key, 3)

    state_size = 16
    params = init_params(kp, state_size)     # f32 unpadded (PyTorch semantics)
    packed = pack_params(params)              # padded + bf16 weights for the kernel

    fwd = jax.jit(actor_forward)

    # Small batch (single grid step).
    batch = 8
    x = jax.random.normal(kx, (batch, state_size), jnp.float32)
    out = jax.block_until_ready(fwd(x, packed))
    ref = reference_forward(x, params)
    assert out.shape == (batch, 3), out.shape
    # bf16 weights / bf16 bias-add vs f32 reference -> relaxed tolerance
    assert jnp.allclose(out, ref, atol=2e-2, rtol=2e-2), "mismatch vs reference (B=8)"

    # Larger, non-tile-multiple batch exercises the padding-aware multi-step grid
    # (B=300 -> two steps of TB=152, only 4 padded rows).
    batch2 = 300
    x2 = jax.random.normal(kx2, (batch2, state_size), jnp.float32)
    out2 = jax.block_until_ready(fwd(x2, packed))
    ref2 = reference_forward(x2, params)
    assert out2.shape == (batch2, 3), out2.shape
    assert jnp.allclose(out2, ref2, atol=2e-2, rtol=2e-2), "mismatch vs reference (B=300)"

    print("KERNEL_OK")
</pallas_src>

<mosaic_0001>
module attributes {stable_mosaic.version = 11 : i64} {
  func.func @actor_kernel(%arg0: i32, %arg1: memref<8x16xf32, #tpu.memory_space<vmem>>, %arg2: memref<16x384xbf16, #tpu.memory_space<vmem>>, %arg3: memref<1x384xbf16, #tpu.memory_space<vmem>>, %arg4: memref<384x640xbf16, #tpu.memory_space<vmem>>, %arg5: memref<1x640xbf16, #tpu.memory_space<vmem>>, %arg6: memref<640x128xbf16, #tpu.memory_space<vmem>>, %arg7: memref<1x8xf32, #tpu.memory_space<vmem>>, %arg8: memref<1x8xf32, #tpu.memory_space<vmem>>, %arg9: memref<1x8xf32, #tpu.memory_space<vmem>>, %arg10: memref<8x8xf32, #tpu.memory_space<vmem>>) attributes {dimension_semantics = [#tpu.dimension_semantics<parallel>], iteration_bounds = array<i64: 1>, scalar_prefetch = 0 : i64, scratch_operands = 0 : i64, tpu.core_type = #tpu.core_type<tc>, window_params = [{transform_indices = @transform_0, window_bounds = array<i64: 8, 16>}, {pipeline_mode = #tpu.pipeline_mode<synchronous>, transform_indices = @transform_1, window_bounds = array<i64: 16, 384>}, {pipeline_mode = #tpu.pipeline_mode<synchronous>, transform_indices = @transform_2, window_bounds = array<i64: 1, 384>}, {pipeline_mode = #tpu.pipeline_mode<synchronous>, transform_indices = @transform_3, window_bounds = array<i64: 384, 640>}, {pipeline_mode = #tpu.pipeline_mode<synchronous>, transform_indices = @transform_4, window_bounds = array<i64: 1, 640>}, {pipeline_mode = #tpu.pipeline_mode<synchronous>, transform_indices = @transform_5, window_bounds = array<i64: 640, 128>}, {pipeline_mode = #tpu.pipeline_mode<synchronous>, transform_indices = @transform_6, window_bounds = array<i64: 1, 8>}, {pipeline_mode = #tpu.pipeline_mode<synchronous>, transform_indices = @transform_7, window_bounds = array<i64: 1, 8>}, {pipeline_mode = #tpu.pipeline_mode<synchronous>, transform_indices = @transform_8, window_bounds = array<i64: 1, 8>}, {transform_indices = @transform_9, window_bounds = array<i64: 8, 8>}]} {
    %c0 = arith.constant 0 : index
    %c0_0 = arith.constant 0 : index
    %0 = vector.load %arg1[%c0, %c0_0] : memref<8x16xf32, #tpu.memory_space<vmem>>, vector<8x16xf32>
    %1 = arith.truncf %0 : vector<8x16xf32> to vector<8x16xbf16>
    %c0_1 = arith.constant 0 : index
    %c0_2 = arith.constant 0 : index
    %2 = vector.load %arg2[%c0_1, %c0_2] : memref<16x384xbf16, #tpu.memory_space<vmem>>, vector<16x384xbf16>
    %cst = arith.constant dense<0.000000e+00> : vector<8x384xf32>
    %3 = tpu.matmul %1, %2, %cst {dimension_numbers = #tpu.dot_dimension_numbers<[1], [0], [0], [1], [0, 0, 1, 1], [], []>} : vector<8x16xbf16>, vector<16x384xbf16>, vector<8x384xf32> -> vector<8x384xf32>
    %4 = arith.truncf %3 : vector<8x384xf32> to vector<8x384xbf16>
    %c0_3 = arith.constant 0 : index
    %c0_4 = arith.constant 0 : index
    %5 = vector.load %arg3[%c0_3, %c0_4] : memref<1x384xbf16, #tpu.memory_space<vmem>>, vector<1x384xbf16>
    %6 = vector.broadcast %5 : vector<1x384xbf16> to vector<8x384xbf16>
    %7 = arith.addf %4, %6 : vector<8x384xbf16>
    %cst_5 = arith.constant 0.000000e+00 : bf16
    %8 = vector.broadcast %cst_5 : bf16 to vector<8x384xbf16>
    %9 = arith.maximumf %7, %8 : vector<8x384xbf16>
    %c0_6 = arith.constant 0 : index
    %c0_7 = arith.constant 0 : index
    %10 = vector.load %arg4[%c0_6, %c0_7] : memref<384x640xbf16, #tpu.memory_space<vmem>>, vector<384x640xbf16>
    %cst_8 = arith.constant dense<0.000000e+00> : vector<8x640xf32>
    %11 = tpu.matmul %9, %10, %cst_8 {dimension_numbers = #tpu.dot_dimension_numbers<[1], [0], [0], [1], [0, 0, 1, 1], [], []>} : vector<8x384xbf16>, vector<384x640xbf16>, vector<8x640xf32> -> vector<8x640xf32>
    %12 = arith.truncf %11 : vector<8x640xf32> to vector<8x640xbf16>
    %c0_9 = arith.constant 0 : index
    %c0_10 = arith.constant 0 : index
    %13 = vector.load %arg5[%c0_9, %c0_10] : memref<1x640xbf16, #tpu.memory_space<vmem>>, vector<1x640xbf16>
    %14 = vector.broadcast %13 : vector<1x640xbf16> to vector<8x640xbf16>
    %15 = arith.addf %12, %14 : vector<8x640xbf16>
    %cst_11 = arith.constant 0.000000e+00 : bf16
    %16 = vector.broadcast %cst_11 : bf16 to vector<8x640xbf16>
    %17 = arith.maximumf %15, %16 : vector<8x640xbf16>
    %c0_12 = arith.constant 0 : index
    %c0_13 = arith.constant 0 : index
    %18 = vector.load %arg6[%c0_12, %c0_13] : memref<640x128xbf16, #tpu.memory_space<vmem>>, vector<640x128xbf16>
    %cst_14 = arith.constant dense<0.000000e+00> : vector<8x128xf32>
    %19 = tpu.matmul %17, %18, %cst_14 {dimension_numbers = #tpu.dot_dimension_numbers<[1], [0], [0], [1], [0, 0, 1, 1], [], []>} : vector<8x640xbf16>, vector<640x128xbf16>, vector<8x128xf32> -> vector<8x128xf32>
    %20 = vector.extract_strided_slice %19 {offsets = [0, 0], sizes = [8, 8], strides = [1, 1]} : vector<8x128xf32> to vector<8x8xf32>
    %c0_15 = arith.constant 0 : index
    %c0_16 = arith.constant 0 : index
    %21 = vector.load %arg7[%c0_15, %c0_16] : memref<1x8xf32, #tpu.memory_space<vmem>>, vector<1x8xf32>
    %22 = vector.broadcast %21 : vector<1x8xf32> to vector<8x8xf32>
    %23 = arith.addf %20, %22 : vector<8x8xf32>
    %24 = arith.negf %23 : vector<8x8xf32>
    %25 = math.exp %24 : vector<8x8xf32>
    %cst_17 = arith.constant 1.000000e+00 : f32
    %26 = vector.broadcast %cst_17 : f32 to vector<8x8xf32>
    %27 = arith.addf %26, %25 : vector<8x8xf32>
    %28 = arith.divf %26, %27 : vector<8x8xf32>
    %c0_18 = arith.constant 0 : index
    %c0_19 = arith.constant 0 : index
    %29 = vector.load %arg8[%c0_18, %c0_19] : memref<1x8xf32, #tpu.memory_space<vmem>>, vector<1x8xf32>
    %30 = vector.broadcast %29 : vector<1x8xf32> to vector<8x8xf32>
    %31 = arith.mulf %28, %30 : vector<8x8xf32>
    %c0_20 = arith.constant 0 : index
    %c0_21 = arith.constant 0 : index
    %32 = vector.load %arg9[%c0_20, %c0_21] : memref<1x8xf32, #tpu.memory_space<vmem>>, vector<1x8xf32>
    %33 = vector.broadcast %32 : vector<1x8xf32> to vector<8x8xf32>
    %34 = arith.addf %31, %33 : vector<8x8xf32>
    %c0_22 = arith.constant 0 : index
    %c0_23 = arith.constant 0 : index
    %35 = vector.load %arg10[%c0_22, %c0_23] : memref<8x8xf32, #tpu.memory_space<vmem>>, vector<8x8xf32>
    tpu.vector_store %arg10[%c0_22, %c0_23], %34 {strides = array<i32>} : memref<8x8xf32, #tpu.memory_space<vmem>>, vector<8x8xf32>,
    return
  }
  func.func @transform_0(%arg0: i32) -> (i32, i32) {
    %c0_i32 = arith.constant 0 : i32
    %c0_i32_0 = arith.constant 0 : i32
    return %arg0, %c0_i32 : i32, i32
  }
  func.func @transform_1(%arg0: i32) -> (i32, i32) {
    %c0_i32 = arith.constant 0 : i32
    %c0_i32_0 = arith.constant 0 : i32
    %c0_i32_1 = arith.constant 0 : i32
    return %c0_i32, %c0_i32_0 : i32, i32
  }
  func.func @transform_2(%arg0: i32) -> (i32, i32) {
    %c0_i32 = arith.constant 0 : i32
    %c0_i32_0 = arith.constant 0 : i32
    %c0_i32_1 = arith.constant 0 : i32
    return %c0_i32, %c0_i32_0 : i32, i32
  }
  func.func @transform_3(%arg0: i32) -> (i32, i32) {
    %c0_i32 = arith.constant 0 : i32
    %c0_i32_0 = arith.constant 0 : i32
    %c0_i32_1 = arith.constant 0 : i32
    return %c0_i32, %c0_i32_0 : i32, i32
  }
  func.func @transform_4(%arg0: i32) -> (i32, i32) {
    %c0_i32 = arith.constant 0 : i32
    %c0_i32_0 = arith.constant 0 : i32
    %c0_i32_1 = arith.constant 0 : i32
    return %c0_i32, %c0_i32_0 : i32, i32
  }
  func.func @transform_5(%arg0: i32) -> (i32, i32) {
    %c0_i32 = arith.constant 0 : i32
    %c0_i32_0 = arith.constant 0 : i32
    %c0_i32_1 = arith.constant 0 : i32
    return %c0_i32, %c0_i32_0 : i32, i32
  }
  func.func @transform_6(%arg0: i32) -> (i32, i32) {
    %c0_i32 = arith.constant 0 : i32
    %c0_i32_0 = arith.constant 0 : i32
    %c0_i32_1 = arith.constant 0 : i32
    return %c0_i32, %c0_i32_0 : i32, i32
  }
  func.func @transform_7(%arg0: i32) -> (i32, i32) {
    %c0_i32 = arith.constant 0 : i32
    %c0_i32_0 = arith.constant 0 : i32
    %c0_i32_1 = arith.constant 0 : i32
    return %c0_i32, %c0_i32_0 : i32, i32
  }
  func.func @transform_8(%arg0: i32) -> (i32, i32) {
    %c0_i32 = arith.constant 0 : i32
    %c0_i32_0 = arith.constant 0 : i32
    %c0_i32_1 = arith.constant 0 : i32
    return %c0_i32, %c0_i32_0 : i32, i32
  }
  func.func @transform_9(%arg0: i32) -> (i32, i32) {
    %c0_i32 = arith.constant 0 : i32
    %c0_i32_0 = arith.constant 0 : i32
    return %arg0, %c0_i32 : i32, i32
  }
}

</mosaic_0001>

<bundles_post_ra>
// kernel: actor_forward.1
= control target key start
LH: loop header
LB: loop body
LE: loop exit
PB: predicated region body
PF: predicated region fallthrough
CT: control target
= control target key end

     0   :  { %14 = vsyncpa [#allocation3], 0  ;;  %s2780_s0 = inlined_call_operand.hbm [shape: f32[8,16], index: 0, kind: input, shape index: {}]   ;;  %s2781_s1 = inlined_call_operand.hbm [shape: bf16[16,384], index: 1, kind: input, shape index: {}]   ;;  %s2782_s2 = inlined_call_operand.hbm [shape: bf16[1,384], index: 2, kind: input, shape index: {}]   ;;  %s2783_s3 = inlined_call_operand.hbm [shape: bf16[384,640], index: 3, kind: input, shape index: {}]   ;;  %s2784_s4 = inlined_call_operand.hbm [shape: bf16[1,640], index: 4, kind: input, shape index: {}]   ;;  %s2785_s5 = inlined_call_operand.hbm [shape: bf16[640,128], index: 5, kind: input, shape index: {}]   ;;  %s2786_s6 = inlined_call_operand.vmem [shape: f32[1,8], index: 6, kind: input, shape index: {}]   ;;  %s2787_s7 = inlined_call_operand.vmem [shape: f32[1,8], index: 7, kind: input, shape index: {}]   ;;  %s2788_s8 = inlined_call_operand.vmem [shape: f32[1,8], index: 8, kind: input, shape index: {}]   ;;  %s2789_s9 = inlined_call_operand.vmem [shape: f32[8,8], index: 9, kind: output, shape index: {}]  }
   0x1   :  { %15 = vsyncpa [#allocation5], 0 }
   0x2   :  { %16 = vsyncpa [#allocation8], 0  ;;  %s33_s11 = sshll.u32 %s2781_s1, 4  ;;  %s34_s11 = int_to_ptr.hbm [resolvable:$true] %s33_s11 }
   0x3   :  { %17 = vsyncpa [#allocation11], 0  ;;  %s2664_s12 = smov [#allocation4]   ;;  %s57_s16 = sshll.u32 %s2783_s3, 4  ;;  %s58_s16 = int_to_ptr.hbm [resolvable:$true] %s57_s16 }
   0x4   :  { %s35_s13 = sshll.u32 %s2664_s12, 4  ;;  %s2665_s17 = smov 192   ;;  %s36_s13 = int_to_ptr.vmem [resolvable:$true] %s35_s13 }
   0x5   :  { %s2666_s18 = smov 12   ;;  %s2667_s19 = smov [#allocation7]  }
   0x6   :  { %41 = dma.hbm_to_vmem [thread:$0]  %s34_s11, 384, %s36_s13, [#allocation5], %s2665_s17, %s2665_s17, %s2666_s18  }
   0x7   :  { %s59_s20 = sshll.u32 %s2667_s19, 4  ;;  %s2668_s21 = smov 320   ;;  %s60_s20 = int_to_ptr.vmem [resolvable:$true] %s59_s20 }
   0x8   :  { %s2669_s22 = smov 20   ;;  %s23_s24 = sshll.u32 %s2780_s0, 4  ;;  %s24_s24 = int_to_ptr.hbm [resolvable:$true] %s23_s24 }
   0x9   :  { %65 = dma.hbm_to_vmem [thread:$0]  %s58_s16, 15360, %s60_s20, [#allocation8], %s2668_s21, %s2668_s21, %s2669_s22  }
   0xa   :  { %s2670_s25 = smov [#allocation2]   ;;  %s47_s28 = sshll.u32 %s2782_s2, 4  ;;  %s48_s28 = int_to_ptr.hbm [resolvable:$true] %s47_s28 }
   0xb   :  { %s25_s26 = sshll.u32 %s2670_s25, 4  ;;  %s2671_s29 = smov [#allocation6]   ;;  %s26_s26 = int_to_ptr.vmem [resolvable:$true] %s25_s26 }
   0xc   :  { %28 = dma.hbm_to_vmem [thread:$0]  %s24_s24, 128, %s26_s26, [#allocation3]  }
   0xd   :  { %s49_s30 = sshll.u32 %s2671_s29, 4  ;;  %s71_s12 = sshll.u32 %s2784_s4, 4  ;;  %s50_s30 = int_to_ptr.vmem [resolvable:$true] %s49_s30  ;;  %s72_s12 = int_to_ptr.hbm [resolvable:$true] %s71_s12 }
   0xe   :  { %52 = dma.hbm_to_vmem [thread:$0]  %s48_s28, 48, %s50_s30, [#allocation5]  }
   0xf   :  { %s81_s14 = sshll.u32 %s2785_s5, 4  ;;  %s2672_s15 = smov [#allocation9]   ;;  %s82_s14 = int_to_ptr.hbm [resolvable:$true] %s81_s14 }
  0x10   :  { %s73_s16 = sshll.u32 %s2672_s15, 4  ;;  %s2673_s2 = smov [#allocation10]   ;;  %s74_s16 = int_to_ptr.vmem [resolvable:$true] %s73_s16 }
  0x11   :  { %76 = dma.hbm_to_vmem [thread:$0]  %s72_s12, 80, %s74_s16, [#allocation8]  }
  0x12   :  { %s83_s17 = sshll.u32 %s2673_s2, 4  ;;  %s2674_s18 = smov 64   ;;  %s84_s17 = int_to_ptr.vmem [resolvable:$true] %s83_s17 }
  0x13   :  { %s2675_s19 = smov 4  }
  0x14   :  { %89 = dma.hbm_to_vmem [thread:$0]  %s82_s14, 5120, %s84_s17, [#allocation11], %s2674_s18, %s2674_s18, %s2675_s19  }
  0x15   :  { %2656 = dma.done.wait [#allocation3], 128  }
  0x16   :  { %2657 = vsyncadd [#allocation3], 4294967168 }
  0x17   :  { %2658 = dma.done.wait [#allocation5], 432  }
  0x18   :  { %2659 = vsyncadd [#allocation5], 4294966864 }
  0x19   :  { %2660 = dma.done.wait [#allocation8], 15440  }
  0x1a   :  { %2661 = vsyncadd [#allocation8], 4294951856 }
  0x1b   :  { %2662 = dma.done.wait [#allocation11], 5120  }
  0x1c   :  { %2663 = vsyncadd [#allocation11], 4294962176  ;;  %v1676_v0 = vld [vmem:[#allocation4] sm:$0xf]  ;;  %v2331_v1 = vld [vmem:[#allocation4 + $0x8] sm:$0xf0] }
  0x1d   :  { %v2330_v2 = vld [vmem:[#allocation4 + $0x4] sm:$0xf]  ;;  %v1677_v3 = vor.u32 %v2331_v1, %v1676_v0  ;;  %v1678_v4 = vld [vmem:[#allocation4 + $0xc] sm:$0xf0]  ;;  %v1684_v5 = vld [vmem:[#allocation4 + $0x8] sm:$0xf] }
  0x1e   :  { %v2332_v6 = vld [vmem:[#allocation4 + $0x10] sm:$0xf0]  ;;  %v1681_v7 = vor.u32 %v2330_v2, %v1678_v4  ;;  %v121_v9 = vld [vmem:[#allocation2] sm:$0xff]  ;;  %vm143_vm0 = vcmask 130048   ;;  %v2370_v11 = vld [vmem:[#allocation7 + $0x128] sm:$0xf0] }
  0x1f   :  { %v1685_v8 = vor.u32 %v2332_v6, %v1684_v5  ;;  %v1831_v10 = vld [vmem:[#allocation7 + $0x118] sm:$0xf]  ;;  %154 = vmatpush.bf16.msra.mxu0 %v1677_v3  ;;  %v122_v12 = vpack.c.bf16 %v121_v9, %v121_v9  ;;  %v2410_v15 = vld [vmem:[#allocation7 + $0x268] sm:$0xf0]  ;;  %v2368_v16 = vld [vmem:[#allocation7 + $0x11c] sm:$0xf] }
  0x20   :  { %v1832_v13 = vor.u32 %v2370_v11, %v1831_v10  ;;  %v1991_v14 = vld [vmem:[#allocation7 + $0x258] sm:$0xf]  ;;  %167 = vmatpush.bf16.msra.mxu1 %v1681_v7  ;;  %v1833_v18 = vld [vmem:[#allocation7 + $0x12c] sm:$0xf0]  ;;  %v2365_v20 = vld [vmem:[#allocation7 + $0x100] sm:$0xf0] }
  0x21   :  { %180 = vmatpush.bf16.msra.mxu2 %v1685_v8  ;;  %v1992_v17 = vor.u32 %v2410_v15, %v1991_v14  ;;  %v1811_v19 = vld [vmem:[#allocation7 + $0xf0] sm:$0xf]  ;;  %v1836_v21 = vor.u32 %v2368_v16, %v1833_v18  ;;  %v2405_v24 = vld [vmem:[#allocation7 + $0x240] sm:$0xf0]  ;;  %v2363_v25 = vld [vmem:[#allocation7 + $0xf4] sm:$0xf] }
  0x22   :  { %991 = vmatpush.bf16.msra.mxu3 %v1832_v13  ;;  %v1812_v22 = vor.u32 %v2365_v20, %v1811_v19  ;;  %v1971_v23 = vld [vmem:[#allocation7 + $0x230] sm:$0xf]  ;;  %1686 = vmatmul.msk.bf16.vlgmr.msra.gmra.mxu0 %vm143_vm0, %v122_v12  ;;  %v1813_v26 = vld [vmem:[#allocation7 + $0x104] sm:$0xf0]  ;;  %v2151_v27 = vld [vmem:[#allocation7 + $0x398] sm:$0xf] }
  0x23   :  { %v2450_v28 = vld [vmem:[#allocation7 + $0x3a8] sm:$0xf0]  ;;  %1687 = vmatmul.msk.bf16.vlgmr.msra.gmra.mxu1 %vm143_vm0, %v122_v12  ;;  %v1791_v30 = vld [vmem:[#allocation7 + $0xc8] sm:$0xf]  ;;  %v2360_v31 = vld [vmem:[#allocation7 + $0xd8] sm:$0xf0]  ;;  %1004 = vmatpush.bf16.msrb.mxu0 %v1992_v17  ;;  %v1972_v32 = vor.u32 %v2405_v24, %v1971_v23  ;;  %v1816_v33 = vor.u32 %v2363_v25, %v1813_v26 }
  0x24   :  { %1688 = vmatmul.msk.bf16.vlgmr.msra.gmra.mxu2 %vm143_vm0, %v122_v12  ;;  %v2152_v29 = vor.u32 %v2450_v28, %v2151_v27  ;;  %v1951_v34 = vld [vmem:[#allocation7 + $0x208] sm:$0xf]  ;;  %v2400_v35 = vld [vmem:[#allocation7 + $0x218] sm:$0xf0]  ;;  %v2358_v36 = vld [vmem:[#allocation7 + $0xcc] sm:$0xf]  ;;  %v1792_v37 = vor.u32 %v2360_v31, %v1791_v30 }
  0x25   :  { %1030 = vmatpush.bf16.msrb.mxu2 %v1836_v21  ;;  %v1793_v38 = vld [vmem:[#allocation7 + $0xdc] sm:$0xf0]  ;;  %v2131_v39 = vld [vmem:[#allocation7 + $0x370] sm:$0xf]  ;;  %v2445_v40 = vld [vmem:[#allocation7 + $0x380] sm:$0xf0]  ;;  %v1952_v45 = vor.u32 %v2400_v35, %v1951_v34 }
  0x26   :  { %992 = vmatpush.bf16.msra.mxu3 %v1812_v22  ;;  %1017 = vmatpush.bf16.msrb.mxu1 %v2152_v29  ;;  %v2132_v41 = vor.u32 %v2445_v40, %v2131_v39  ;;  %v1771_v42 = vld [vmem:[#allocation7 + $0xa0] sm:$0xf]  ;;  %v2355_v43 = vld [vmem:[#allocation7 + $0xb0] sm:$0xf0]  ;;  %v2111_v44 = vld [vmem:[#allocation7 + $0x348] sm:$0xf]  ;;  %v1796_v46 = vor.u32 %v2358_v36, %v1793_v38 }
  0x27   :  { %1005 = vmatpush.bf16.msrb.mxu0 %v1972_v32  ;;  %v1931_v47 = vld [vmem:[#allocation7 + $0x1e0] sm:$0xf]  ;;  %v2395_v48 = vld [vmem:[#allocation7 + $0x1f0] sm:$0xf0]  ;;  %v2440_v49 = vld [vmem:[#allocation7 + $0x358] sm:$0xf0]  ;;  %v1772_v50 = vor.u32 %v2355_v43, %v1771_v42 }
  0x28   :  { %v2353_v51 = vld [vmem:[#allocation7 + $0xa4] sm:$0xf]  ;;  %v1773_v52 = vld [vmem:[#allocation7 + $0xb4] sm:$0xf0]  ;;  %v2112_v53 = vor.u32 %v2440_v49, %v2111_v44  ;;  %v2350_v55 = vld [vmem:[#allocation7 + $0x88] sm:$0xf0]  ;;  %v1932_v58 = vor.u32 %v2395_v48, %v1931_v47 }
  0x29   :  { %1031 = vmatpush.bf16.msrb.mxu2 %v1816_v33  ;;  %v1751_v54 = vld [vmem:[#allocation7 + $0x78] sm:$0xf]  ;;  %v2091_v56 = vld [vmem:[#allocation7 + $0x320] sm:$0xf]  ;;  %v2435_v57 = vld [vmem:[#allocation7 + $0x330] sm:$0xf0]  ;;  %v1776_v59 = vor.u32 %v2353_v51, %v1773_v52 }
  0x2a   :  { %993 = vmatpush.bf16.msra.mxu3 %v1792_v37  ;;  %1018 = vmatpush.bf16.msrb.mxu1 %v2132_v41  ;;  %v1911_v60 = vld [vmem:[#allocation7 + $0x1b8] sm:$0xf]  ;;  %v2390_v61 = vld [vmem:[#allocation7 + $0x1c8] sm:$0xf0]  ;;  %v1752_v62 = vor.u32 %v2350_v55, %v1751_v54  ;;  %v2348_v63 = vld [vmem:[#allocation7 + $0x7c] sm:$0xf]  ;;  %v2092_v1 = vor.u32 %v2435_v57, %v2091_v56 }
  0x2b   :  { %1006 = vmatpush.bf16.msrb.mxu0 %v1952_v45  ;;  %v1753_v0 = vld [vmem:[#allocation7 + $0x8c] sm:$0xf0]  ;;  %v2345_v3 = vld [vmem:[#allocation7 + $0x60] sm:$0xf0]  ;;  %v2071_v4 = vld [vmem:[#allocation7 + $0x2f8] sm:$0xf]  ;;  %v1912_v6 = vor.u32 %v2390_v61, %v1911_v60 }
  0x2c   :  { %v1731_v2 = vld [vmem:[#allocation7 + $0x50] sm:$0xf]  ;;  %v2430_v5 = vld [vmem:[#allocation7 + $0x308] sm:$0xf0]  ;;  %v1756_v7 = vor.u32 %v2348_v63, %v1753_v0  ;;  %v2385_v9 = vld [vmem:[#allocation7 + $0x1a0] sm:$0xf0] }
  0x2d   :  { %1032 = vmatpush.bf16.msrb.mxu2 %v1796_v46  ;;  %v1891_v8 = vld [vmem:[#allocation7 + $0x190] sm:$0xf]  ;;  %v1732_v10 = vor.u32 %v2345_v3, %v1731_v2  ;;  %v2343_v11 = vld [vmem:[#allocation7 + $0x54] sm:$0xf]  ;;  %v1733_v12 = vld [vmem:[#allocation7 + $0x64] sm:$0xf0]  ;;  %v2072_v13 = vor.u32 %v2430_v5, %v2071_v4 }
  0x2e   :  { %994 = vmatpush.bf16.msra.mxu3 %v1772_v50  ;;  %1019 = vmatpush.bf16.msrb.mxu1 %v2112_v53  ;;  %v1711_v14 = vld [vmem:[#allocation7 + $0x28] sm:$0xf]  ;;  %v2340_v15 = vld [vmem:[#allocation7 + $0x38] sm:$0xf0]  ;;  %v2051_v16 = vld [vmem:[#allocation7 + $0x2d0] sm:$0xf]  ;;  %v1892_v18 = vor.u32 %v2385_v9, %v1891_v8  ;;  %v1736_v19 = vor.u32 %v2343_v11, %v1733_v12 }
  0x2f   :  { %1007 = vmatpush.bf16.msrb.mxu0 %v1932_v58  ;;  %v2425_v17 = vld [vmem:[#allocation7 + $0x2e0] sm:$0xf0]  ;;  %v1871_v20 = vld [vmem:[#allocation7 + $0x168] sm:$0xf]  ;;  %v2380_v21 = vld [vmem:[#allocation7 + $0x178] sm:$0xf0]  ;;  %v1712_v22 = vor.u32 %v2340_v15, %v1711_v14 }
  0x30   :  { %v2338_v23 = vld [vmem:[#allocation7 + $0x2c] sm:$0xf]  ;;  %v1713_v24 = vld [vmem:[#allocation7 + $0x3c] sm:$0xf0]  ;;  %v2052_v25 = vor.u32 %v2425_v17, %v2051_v16  ;;  %v2335_v27 = vld [vmem:[#allocation7 + $0x10] sm:$0xf0]  ;;  %v1872_v32 = vor.u32 %v2380_v21, %v1871_v20 }
  0x31   :  { %1033 = vmatpush.bf16.msrb.mxu2 %v1776_v59  ;;  %v1691_v26 = vld [vmem:[#allocation7] sm:$0xf]  ;;  %v2031_v28 = vld [vmem:[#allocation7 + $0x2a8] sm:$0xf]  ;;  %v2420_v29 = vld [vmem:[#allocation7 + $0x2b8] sm:$0xf0]  ;;  %v1716_v33 = vor.u32 %v2338_v23, %v1713_v24 }
  0x32   :  { %995 = vmatpush.bf16.msra.mxu3 %v1752_v62  ;;  %1020 = vmatpush.bf16.msrb.mxu1 %v2092_v1  ;;  %v2408_v30 = vld [vmem:[#allocation7 + $0x25c] sm:$0xf]  ;;  %v1993_v31 = vld [vmem:[#allocation7 + $0x26c] sm:$0xf0]  ;;  %v1851_v34 = vld [vmem:[#allocation7 + $0x140] sm:$0xf]  ;;  %v1692_v37 = vor.u32 %v2335_v27, %v1691_v26  ;;  %v2032_v41 = vor.u32 %v2420_v29, %v2031_v28 }
  0x33   :  { %1008 = vmatpush.bf16.msrb.mxu0 %v1912_v6  ;;  %v2375_v35 = vld [vmem:[#allocation7 + $0x150] sm:$0xf0]  ;;  %v2333_v36 = vld [vmem:[#allocation7 + $0x4] sm:$0xf]  ;;  %v1693_v38 = vld [vmem:[#allocation7 + $0x14] sm:$0xf0]  ;;  %v1996_v42 = vor.u32 %v2408_v30, %v1993_v31 }
  0x34   :  { %v2448_v39 = vld [vmem:[#allocation7 + $0x39c] sm:$0xf]  ;;  %v2153_v40 = vld [vmem:[#allocation7 + $0x3ac] sm:$0xf0]  ;;  %v1999_v43 = vld [vmem:[#allocation7 + $0x260] sm:$0xf]  ;;  %v1852_v49 = vor.u32 %v2375_v35, %v1851_v34  ;;  %v1696_v50 = vor.u32 %v2333_v36, %v1693_v38 }
  0x35   :  { %1034 = vmatpush.bf16.msrb.mxu2 %v1756_v7  ;;  %v2411_v44 = vld [vmem:[#allocation7 + $0x270] sm:$0xf0]  ;;  %v1973_v46 = vld [vmem:[#allocation7 + $0x244] sm:$0xf0]  ;;  %v2011_v47 = vld [vmem:[#allocation7 + $0x280] sm:$0xf]  ;;  %v2156_v53 = vor.u32 %v2448_v39, %v2153_v40 }
  0x36   :  { %996 = vmatpush.bf16.msra.mxu3 %v1732_v10  ;;  %1021 = vmatpush.bf16.msrb.mxu1 %v2072_v13  ;;  %v2403_v45 = vld [vmem:[#allocation7 + $0x234] sm:$0xf]  ;;  %v1839_v51 = vld [vmem:[#allocation7 + $0x120] sm:$0xf]  ;;  %v2000_v54 = vor.u32 %v2411_v44, %v1999_v43  ;;  %v2133_v56 = vld [vmem:[#allocation7 + $0x384] sm:$0xf0] }
  0x37   :  { %1009 = vmatpush.bf16.msrb.mxu0 %v1892_v18  ;;  %v2415_v48 = vld [vmem:[#allocation7 + $0x290] sm:$0xf0]  ;;  %v1976_v57 = vor.u32 %v2403_v45, %v1973_v46  ;;  %v1979_v59 = vld [vmem:[#allocation7 + $0x238] sm:$0xf]  ;;  %v2406_v60 = vld [vmem:[#allocation7 + $0x248] sm:$0xf0] }
  0x38   :  { %v2371_v52 = vld [vmem:[#allocation7 + $0x130] sm:$0xf0]  ;;  %v2012_v58 = vor.u32 %v2415_v48, %v2011_v47  ;;  %v2398_v61 = vld [vmem:[#allocation7 + $0x20c] sm:$0xf]  ;;  %v1953_v63 = vld [vmem:[#allocation7 + $0x21c] sm:$0xf0]  ;;  %v1980_v3 = vor.u32 %v2406_v60, %v1979_v59 }
  0x39   :  { %1035 = vmatpush.bf16.msrb.mxu2 %v1736_v19  ;;  %v2443_v55 = vld [vmem:[#allocation7 + $0x374] sm:$0xf]  ;;  %v1840_v62 = vor.u32 %v2371_v52, %v1839_v51  ;;  %v1819_v0 = vld [vmem:[#allocation7 + $0xf8] sm:$0xf]  ;;  %v2366_v1 = vld [vmem:[#allocation7 + $0x108] sm:$0xf0]  ;;  %v1956_v5 = vor.u32 %v2398_v61, %v1953_v63 }
  0x3a   :  { %997 = vmatpush.bf16.msra.mxu3 %v1712_v22  ;;  %1022 = vmatpush.bf16.msrb.mxu1 %v2052_v25  ;;  %v2136_v2 = vor.u32 %v2443_v55, %v2133_v56  ;;  %v2438_v4 = vld [vmem:[#allocation7 + $0x34c] sm:$0xf]  ;;  %v2113_v6 = vld [vmem:[#allocation7 + $0x35c] sm:$0xf0]  ;;  %v1959_v7 = vld [vmem:[#allocation7 + $0x210] sm:$0xf]  ;;  %v1820_v9 = vor.u32 %v2366_v1, %v1819_v0 }
  0x3b   :  { %1010 = vmatpush.bf16.msrb.mxu0 %v1872_v32  ;;  %v2401_v8 = vld [vmem:[#allocation7 + $0x220] sm:$0xf0]  ;;  %v1933_v11 = vld [vmem:[#allocation7 + $0x1f4] sm:$0xf0]  ;;  %v1799_v12 = vld [vmem:[#allocation7 + $0xd0] sm:$0xf]  ;;  %v2116_v14 = vor.u32 %v2438_v4, %v2113_v6 }
  0x3c   :  { %v2393_v10 = vld [vmem:[#allocation7 + $0x1e4] sm:$0xf]  ;;  %v1960_v15 = vor.u32 %v2401_v8, %v1959_v7  ;;  %v2093_v18 = vld [vmem:[#allocation7 + $0x334] sm:$0xf0]  ;;  %v1939_v19 = vld [vmem:[#allocation7 + $0x1e8] sm:$0xf] }
  0x3d   :  { %1036 = vmatpush.bf16.msrb.mxu2 %v1716_v33  ;;  %v2361_v13 = vld [vmem:[#allocation7 + $0xe0] sm:$0xf0]  ;;  %v1936_v17 = vor.u32 %v2393_v10, %v1933_v11  ;;  %v2396_v20 = vld [vmem:[#allocation7 + $0x1f8] sm:$0xf0]  ;;  %v1913_v23 = vld [vmem:[#allocation7 + $0x1cc] sm:$0xf0] }
  0x3e   :  { %998 = vmatpush.bf16.msra.mxu3 %v1692_v37  ;;  %1023 = vmatpush.bf16.msrb.mxu1 %v2032_v41  ;;  %v2433_v16 = vld [vmem:[#allocation7 + $0x324] sm:$0xf]  ;;  %v1800_v21 = vor.u32 %v2361_v13, %v1799_v12  ;;  %v2388_v22 = vld [vmem:[#allocation7 + $0x1bc] sm:$0xf]  ;;  %v1940_v25 = vor.u32 %v2396_v20, %v1939_v19  ;;  %v2073_v28 = vld [vmem:[#allocation7 + $0x30c] sm:$0xf0] }
  0x3f   :  { %1011 = vmatpush.bf16.msrb.mxu0 %v1852_v49  ;;  %v2096_v24 = vor.u32 %v2433_v16, %v2093_v18  ;;  %v2428_v26 = vld [vmem:[#allocation7 + $0x2fc] sm:$0xf]  ;;  %v1916_v27 = vor.u32 %v2388_v22, %v1913_v23  ;;  %v1919_v29 = vld [vmem:[#allocation7 + $0x1c0] sm:$0xf]  ;;  %v2391_v30 = vld [vmem:[#allocation7 + $0x1d0] sm:$0xf0] }
  0x40   :  { %v2076_v31 = vor.u32 %v2428_v26, %v2073_v28  ;;  %v1920_v32 = vor.u32 %v2391_v30, %v1919_v29  ;;  %v188_v33 = vld [vmem:[#allocation6] sm:$0x7]  ;;  %v1779_v34 = vld [vmem:[#allocation7 + $0xa8] sm:$0xf]  ;;  %v2383_v37 = vld [vmem:[#allocation7 + $0x194] sm:$0xf] }
  0x41   :  { %1037 = vmatpush.bf16.msrb.mxu2 %v1696_v50  ;;  %190 = vst [vmem:[#allocation1] ss:$9 sm:$0xff] %v188_v33  ;;  %v2356_v35 = vld [vmem:[#allocation7 + $0xb8] sm:$0xf0]  ;;  %v1893_v38 = vld [vmem:[#allocation7 + $0x1a4] sm:$0xf0] }
  0x42   :  { %1043 = vmatpush.bf16.msrb.mxu3 %v1996_v42  ;;  %1024 = vmatpush.bf16.msrb.mxu1 %v2012_v58  ;;  %v1780_v36 = vor.u32 %v2356_v35, %v1779_v34  ;;  %v2423_v39 = vld [vmem:[#allocation7 + $0x2d4] sm:$0xf]  ;;  %v1896_v40 = vor.u32 %v2383_v37, %v1893_v38  ;;  %v2053_v41 = vld [vmem:[#allocation7 + $0x2e4] sm:$0xf0]  ;;  %v1899_v42 = vld [vmem:[#allocation7 + $0x198] sm:$0xf] }
  0x43   :  { %1056 = vmatpush.bf16.msra.mxu0 %v2156_v53  ;;  %v2386_v43 = vld [vmem:[#allocation7 + $0x1a8] sm:$0xf0]  ;;  %v2056_v44 = vor.u32 %v2423_v39, %v2053_v41  ;;  %v1759_v46 = vld [vmem:[#allocation7 + $0x80] sm:$0xf]  ;;  %v2351_v47 = vld [vmem:[#allocation7 + $0x90] sm:$0xf0] }
  0x44   :  { %v1900_v45 = vor.u32 %v2386_v43, %v1899_v42  ;;  %v1760_v48 = vor.u32 %v2351_v47, %v1759_v46  ;;  %v2378_v49 = vld [vmem:[#allocation7 + $0x16c] sm:$0xf]  ;;  %v1873_v50 = vld [vmem:[#allocation7 + $0x17c] sm:$0xf0]  ;;  %v2381_v56 = vld [vmem:[#allocation7 + $0x180] sm:$0xf0] }
  0x45   :  { %1082 = vmatpush.bf16.msra.mxu2 %v2000_v54  ;;  %v2418_v51 = vld [vmem:[#allocation7 + $0x2ac] sm:$0xf]  ;;  %v1876_v52 = vor.u32 %v2378_v49, %v1873_v50  ;;  %v2033_v53 = vld [vmem:[#allocation7 + $0x2bc] sm:$0xf0]  ;;  %v1879_v54 = vld [vmem:[#allocation7 + $0x170] sm:$0xf] }
  0x46   :  { %1044 = vmatpush.bf16.msrb.mxu3 %v1976_v57  ;;  %1069 = vmatpush.bf16.msra.mxu1 %v1840_v62  ;;  %v2036_v55 = vor.u32 %v2418_v51, %v2033_v53  ;;  %v1739_v57 = vld [vmem:[#allocation7 + $0x58] sm:$0xf]  ;;  %v2346_v58 = vld [vmem:[#allocation7 + $0x68] sm:$0xf0]  ;;  %v1880_v59 = vor.u32 %v2381_v56, %v1879_v54  ;;  %v2373_v61 = vld [vmem:[#allocation7 + $0x144] sm:$0xf] }
  0x47   :  { %1057 = vmatpush.bf16.msra.mxu0 %v2136_v2  ;;  %v1740_v60 = vor.u32 %v2346_v58, %v1739_v57  ;;  %v1853_v62 = vld [vmem:[#allocation7 + $0x154] sm:$0xf0]  ;;  %v2413_v0 = vld [vmem:[#allocation7 + $0x284] sm:$0xf]  ;;  %v2376_v4 = vld [vmem:[#allocation7 + $0x158] sm:$0xf0] }
  0x48   :  { %v1856_v63 = vor.u32 %v2373_v61, %v1853_v62  ;;  %v2013_v1 = vld [vmem:[#allocation7 + $0x294] sm:$0xf0]  ;;  %v1719_v6 = vld [vmem:[#allocation7 + $0x30] sm:$0xf]  ;;  %v2341_v7 = vld [vmem:[#allocation7 + $0x40] sm:$0xf0] }
  0x49   :  { %1083 = vmatpush.bf16.msra.mxu2 %v1980_v3  ;;  %v2016_v2 = vor.u32 %v2413_v0, %v2013_v1  ;;  %v1859_v3 = vld [vmem:[#allocation7 + $0x148] sm:$0xf]  ;;  %v1720_v8 = vor.u32 %v2341_v7, %v1719_v6  ;;  %v192_v10 = vld [vmem:[#allocation1 + $0x9] sm:$0xff]  ;;  %v1841_v34 = vld [vmem:[#allocation7 + $0x134] sm:$0xf0]  ;;  %vm1664_vm5 = vcmask 64512  }
  0x4a   :  { %1045 = vmatpush.bf16.msrb.mxu3 %v1956_v5  ;;  %1070 = vmatpush.bf16.msra.mxu1 %v1820_v9  ;;  %v1860_v5 = vor.u32 %v2376_v4, %v1859_v3  ;;  %v191_v9 = vld [vmem:[#allocation1] sm:$0xff]  ;;  %v193_v11 = vld [vmem:[#allocation1 + $0x12] sm:$0xff]  ;;  %v1189_v12 = vld [vmem:[#allocation9] sm:$0x1f] }
  0x4b   :  { %1058 = vmatpush.bf16.msra.mxu0 %v2116_v14  ;;  %v1699_v13 = vld [vmem:[#allocation7 + $0x8] sm:$0xf]  ;;  %1191 = vst [vmem:[#allocation1] ss:$9 sm:$0xff] %v1189_v12  ;;  %v2336_v14 = vld [vmem:[#allocation7 + $0x18] sm:$0xf0]  ;;  %v194_v16 = vpack.i.b16 %v191_v9, %v191_v9 }
  0x4c   :  { %v2159_v29 = vld [vmem:[#allocation7 + $0x3a0] sm:$0xf]  ;;  %v2369_v33 = vld [vmem:[#allocation7 + $0x124] sm:$0xf]  ;;  %v2161_v37 = vld [vmem:[#allocation7 + $0x3b4] sm:$0xf0] }
  0x4d   :  { %1084 = vmatpush.bf16.msra.mxu2 %v1960_v15  ;;  %v1700_v15 = vor.u32 %v2336_v14, %v1699_v13  ;;  %v196_v18 = vperm.slane %v194_v16, 0  ;;  %v2139_v50 = vld [vmem:[#allocation7 + $0x378] sm:$0xf]  ;;  %v2446_v51 = vld [vmem:[#allocation7 + $0x388] sm:$0xf0] }
  0x4e   :  { %1046 = vmatpush.bf16.msrb.mxu3 %v1936_v17  ;;  %1071 = vmatpush.bf16.msra.mxu1 %v1800_v21  ;;  %v197_v17 = vpack.i.b16 %v192_v10, %v192_v10  ;;  %v200_v21 = vpack.i.b16 %v193_v11, %v193_v11  ;;  %v1821_v53 = vld [vmem:[#allocation7 + $0x10c] sm:$0xf0]  ;;  %v2444_v54 = vld [vmem:[#allocation7 + $0x37c] sm:$0xf]  ;;  %v2140_v57 = vor.u32 %v2446_v51, %v2139_v50  ;;  %v2409_v58 = vld [vmem:[#allocation7 + $0x264] sm:$0xf] }
  0x4f   :  { %1059 = vmatpush.bf16.msra.mxu0 %v2096_v24  ;;  %v206_v24 = vunpack.c.l.bf16 %v196_v18  ;;  %v2441_v0 = vld [vmem:[#allocation7 + $0x360] sm:$0xf0]  ;;  %v2359_v1 = vld [vmem:[#allocation7 + $0xd4] sm:$0xf]  ;;  %v1801_v3 = vld [vmem:[#allocation7 + $0xe4] sm:$0xf0] }
  0x50   :  { %v199_v19 = vperm.slane %v197_v17, 0  ;;  %v202_v28 = vperm.slane %v200_v21, 0  ;;  %v2439_v4 = vld [vmem:[#allocation7 + $0x354] sm:$0xf]  ;;  %v2404_v9 = vld [vmem:[#allocation7 + $0x23c] sm:$0xf]  ;;  %v1804_v11 = vor.u32 %v2359_v1, %v1801_v3 }
  0x51   :  { %1085 = vmatpush.bf16.msra.mxu2 %v1940_v25  ;;  %v1981_v10 = vld [vmem:[#allocation7 + $0x24c] sm:$0xf0]  ;;  %v2099_v13 = vld [vmem:[#allocation7 + $0x328] sm:$0xf]  ;;  %v2436_v14 = vld [vmem:[#allocation7 + $0x338] sm:$0xf0] }
  0x52   :  { %1047 = vmatpush.bf16.msrb.mxu3 %v1916_v27  ;;  %1072 = vmatpush.bf16.msra.mxu1 %v1780_v36  ;;  %v207_v25 = vunpack.c.l.bf16 %v199_v19  ;;  %v2449_v36 = vld [vmem:[#allocation7 + $0x3a4] sm:$0xf]  ;;  %v208_v41 = vunpack.c.l.bf16 %v202_v28  ;;  %v1781_v16 = vld [vmem:[#allocation7 + $0xbc] sm:$0xf0]  ;;  %v2434_v17 = vld [vmem:[#allocation7 + $0x32c] sm:$0xf]  ;;  %v1984_v19 = vor.u32 %v2404_v9, %v1981_v10 }
  0x53   :  { %1060 = vmatpush.bf16.msra.mxu0 %v2076_v31  ;;  %v2164_v49 = vor.u32 %v2449_v36, %v2161_v37  ;;  %v2101_v18 = vld [vmem:[#allocation7 + $0x33c] sm:$0xf0]  ;;  %v2399_v21 = vld [vmem:[#allocation7 + $0x214] sm:$0xf]  ;;  %v1761_v28 = vld [vmem:[#allocation7 + $0x94] sm:$0xf0] }
  0x54   :  { %v2059_v36 = vld [vmem:[#allocation7 + $0x2d8] sm:$0xf]  ;;  %v2039_v50 = vld [vmem:[#allocation7 + $0x2b0] sm:$0xf]  ;;  %v2414_v3 = vld [vmem:[#allocation7 + $0x28c] sm:$0xf] }
  0x55   :  { %1086 = vmatpush.bf16.msra.mxu2 %v1920_v32  ;;  %v2451_v32 = vld [vmem:[#allocation7 + $0x3b0] sm:$0xf0]  ;;  %v2007_v9 = vld [vmem:[#allocation7 + $0x268] sm:$0xf]  ;;  %v2412_v10 = vld [vmem:[#allocation7 + $0x278] sm:$0xf0] }
  0x56   :  { %1048 = vmatpush.bf16.msrb.mxu3 %v1896_v40  ;;  %1073 = vmatpush.bf16.msra.mxu1 %v1760_v48 }
  0x57   :  { %1061 = vmatpush.bf16.msra.mxu0 %v2056_v44  ;;  %v2160_v44 = vor.u32 %v2451_v32, %v2159_v29  ;;  %v2394_v32 = vld [vmem:[#allocation7 + $0x1ec] sm:$0xf] }
  0x59   :  { %1087 = vmatpush.bf16.msra.mxu2 %v1900_v45  ;;  %v1844_v45 = vor.u32 %v2369_v33, %v1841_v34  ;;  %v1941_v33 = vld [vmem:[#allocation7 + $0x1fc] sm:$0xf0] }
  0x5a   :  { %1049 = vmatpush.bf16.msrb.mxu3 %v1876_v52  ;;  %1074 = vmatpush.bf16.msra.mxu1 %v1740_v60  ;;  %v2364_v52 = vld [vmem:[#allocation7 + $0xfc] sm:$0xf]  ;;  %v2119_v60 = vld [vmem:[#allocation7 + $0x350] sm:$0xf] }
  0x5b   :  { %1062 = vmatpush.bf16.msra.mxu0 %v2036_v55  ;;  %v2141_v55 = vld [vmem:[#allocation7 + $0x38c] sm:$0xf0]  ;;  %v1824_v62 = vor.u32 %v2364_v52, %v1821_v53  ;;  %v2421_v52 = vld [vmem:[#allocation7 + $0x2c0] sm:$0xf0]  ;;  %v2339_v53 = vld [vmem:[#allocation7 + $0x34] sm:$0xf] }
  0x5d   :  { %1088 = vmatpush.bf16.msra.mxu2 %v1880_v59  ;;  %v2001_v59 = vld [vmem:[#allocation7 + $0x274] sm:$0xf0] }
  0x5e   :  { %1050 = vmatpush.bf16.msrb.mxu3 %v1856_v63  ;;  %1075 = vmatpush.bf16.msra.mxu1 %v1720_v8  ;;  %v2144_v63 = vor.u32 %v2444_v54, %v2141_v55  ;;  %v2004_v7 = vor.u32 %v2409_v58, %v2001_v59  ;;  %v2120_v8 = vor.u32 %v2441_v0, %v2119_v60  ;;  %v1721_v54 = vld [vmem:[#allocation7 + $0x44] sm:$0xf0]  ;;  %v2384_v58 = vld [vmem:[#allocation7 + $0x19c] sm:$0xf]  ;;  %v1901_v59 = vld [vmem:[#allocation7 + $0x1ac] sm:$0xf0] }
  0x5f   :  { %1063 = vmatpush.bf16.msra.mxu0 %v2016_v2  ;;  %v2040_v60 = vor.u32 %v2421_v52, %v2039_v50  ;;  %v2334_v0 = vld [vmem:[#allocation7 + $0xc] sm:$0xf]  ;;  %v1767_v50 = vld [vmem:[#allocation7 + $0x88] sm:$0xf] }
  0x61   :  { %1089 = vmatpush.bf16.msra.mxu2 %v1860_v5  ;;  %v2121_v5 = vld [vmem:[#allocation7 + $0x364] sm:$0xf0] }
  0x62   :  { %1076 = vmatpush.bf16.msra.mxu1 %v1700_v15  ;;  %v2124_v12 = vor.u32 %v2439_v4, %v2121_v5  ;;  %v2354_v15 = vld [vmem:[#allocation7 + $0xac] sm:$0xf]  ;;  %v2021_v4 = vld [vmem:[#allocation7 + $0x29c] sm:$0xf0]  ;;  %v1904_v5 = vor.u32 %v2384_v58, %v1901_v59 }
  0x63   :  { %v1747_v59 = vld [vmem:[#allocation7 + $0x60] sm:$0xf] }
  0x9f   :  { %v156_v20 = vpop.f32.mrf.mxu0 }
  0xa0   :  { %v169_v22 = vpop.f32.mrf.mxu1 }
  0xa1   :  { %v186_v23 = vpack.c.bf16 %v169_v22, %v156_v20  ;;  %v2100_v20 = vor.u32 %v2436_v14, %v2099_v13  ;;  %v1961_v22 = vld [vmem:[#allocation7 + $0x224] sm:$0xf0] }
  0xa2   :  { %v1964_v29 = vor.u32 %v2399_v21, %v1961_v22  ;;  %v1987_v21 = vld [vmem:[#allocation7 + $0x240] sm:$0xf]  ;;  %v2407_v22 = vld [vmem:[#allocation7 + $0x250] sm:$0xf0] }
  0xa3   :  { %v203_v26 = vunpack.c.l.bf16 %v186_v23  ;;  %v204_v27 = vunpack.c.h.bf16 %v186_v23  ;;  %v1784_v23 = vor.u32 %v2354_v15, %v1781_v16  ;;  %v2024_v15 = vor.u32 %v2414_v3, %v2021_v4  ;;  %v1727_v4 = vld [vmem:[#allocation7 + $0x38] sm:$0xf] }
  0xa5   :  { %v209_v30 = vadd.f32 %v206_v24, %v203_v26  ;;  %v210_v31 = vadd.f32 %v207_v25, %v204_v27  ;;  %v2104_v24 = vor.u32 %v2434_v17, %v2101_v18  ;;  %v2079_v25 = vld [vmem:[#allocation7 + $0x300] sm:$0xf]  ;;  %v2431_v26 = vld [vmem:[#allocation7 + $0x310] sm:$0xf0]  ;;  %v2349_v27 = vld [vmem:[#allocation7 + $0x84] sm:$0xf]  ;;  %v2008_v17 = vor.u32 %v2412_v10, %v2007_v9 }
  0xa6   :  { %v2080_v34 = vor.u32 %v2431_v26, %v2079_v25  ;;  %v2167_v25 = vld [vmem:[#allocation7 + $0x3a8] sm:$0xf]  ;;  %v2452_v26 = vld [vmem:[#allocation7 + $0x3b8] sm:$0xf0]  ;;  %v2382_v9 = vld [vmem:[#allocation7 + $0x188] sm:$0xf0] }
  0xa7   :  { %v182_v35 = vpop.f32.mrf.mxu2  ;;  %v217_v38 = vmax.f32 %v209_v30, 0.0  ;;  %v218_v39 = vmax.f32 %v210_v31, 0.0  ;;  %v158_v42 = vpop.f32.mrf.mxu0  ;;  %v2429_v30 = vld [vmem:[#allocation7 + $0x304] sm:$0xf]  ;;  %v2081_v31 = vld [vmem:[#allocation7 + $0x314] sm:$0xf0] }
  0xa8   :  { %v187_v40 = vpack.c.bf16 %v182_v35, %v182_v35  ;;  %v171_v43 = vpop.f32.mrf.mxu1  ;;  %v1764_v35 = vor.u32 %v2349_v27, %v1761_v28  ;;  %v2084_v37 = vor.u32 %v2429_v30, %v2081_v31  ;;  %v2424_v42 = vld [vmem:[#allocation7 + $0x2dc] sm:$0xf]  ;;  %v1988_v28 = vor.u32 %v2407_v22, %v1987_v21  ;;  %v1807_v30 = vld [vmem:[#allocation7 + $0xd8] sm:$0xf]  ;;  %v2362_v31 = vld [vmem:[#allocation7 + $0xe8] sm:$0xf0] }
  0xa9   :  { %v2747_v46 = vpack.c.bf16 %v217_v38, %v217_v38  ;;  %v2749_v47 = vpack.c.bf16 %v218_v39, %v218_v39  ;;  %v2426_v38 = vld [vmem:[#allocation7 + $0x2e8] sm:$0xf0]  ;;  %v2344_v39 = vld [vmem:[#allocation7 + $0x5c] sm:$0xf]  ;;  %v2061_v43 = vld [vmem:[#allocation7 + $0x2ec] sm:$0xf0] }
  0xaa   :  { %v205_v48 = vunpack.c.l.bf16 %v187_v40  ;;  %v1741_v40 = vld [vmem:[#allocation7 + $0x6c] sm:$0xf0]  ;;  %v2064_v51 = vor.u32 %v2424_v42, %v2061_v43  ;;  %v2397_v43 = vld [vmem:[#allocation7 + $0x200] sm:$0xf0]  ;;  %v2067_v10 = vld [vmem:[#allocation7 + $0x2e0] sm:$0xf] }
  0xab   :  { %999 = vmatmul.bf16.vlgmr.msra.gmra.mxu3 %v2747_v46  ;;  %1012 = vmatmul.bf16.vlgmr.msrb.gmra.mxu0 %v2749_v47  ;;  %v1947_v42 = vld [vmem:[#allocation7 + $0x1f0] sm:$0xf] }
  0xac   :  { %v211_v56 = vadd.f32 %v208_v41, %v205_v48  ;;  %1038 = vmatmul.bf16.vlgmr.msrb.gmra.mxu2 %v2747_v46  ;;  %1095 = vmatpush.bf16.msra.mxu3 %v2160_v44  ;;  %v1944_v41 = vor.u32 %v2394_v32, %v1941_v33  ;;  %v2389_v44 = vld [vmem:[#allocation7 + $0x1c4] sm:$0xf]  ;;  %v2060_v48 = vor.u32 %v2426_v38, %v2059_v36  ;;  %v1967_v33 = vld [vmem:[#allocation7 + $0x218] sm:$0xf]  ;;  %v2447_v36 = vld [vmem:[#allocation7 + $0x390] sm:$0xf0] }
  0xad   :  { %1108 = vmatpush.bf16.msrb.mxu0 %v1844_v45  ;;  %1134 = vmatpush.bf16.msrb.mxu2 %v2164_v49  ;;  %v1921_v45 = vld [vmem:[#allocation7 + $0x1d4] sm:$0xf0]  ;;  %v1744_v49 = vor.u32 %v2344_v39, %v1741_v40  ;;  %v2168_v32 = vor.u32 %v2452_v26, %v2167_v25  ;;  %v1787_v39 = vld [vmem:[#allocation7 + $0xb0] sm:$0xf]  ;;  %v2357_v40 = vld [vmem:[#allocation7 + $0xc0] sm:$0xf0] }
  0xae   :  { %v219_v61 = vmax.f32 %v211_v56, 0.0  ;;  %v1924_v55 = vor.u32 %v2389_v44, %v1921_v45  ;;  %v2419_v56 = vld [vmem:[#allocation7 + $0x2b4] sm:$0xf]  ;;  %v2127_v44 = vld [vmem:[#allocation7 + $0x358] sm:$0xf] }
  0xaf   :  { %v184_v2 = vpop.f32.mrf.mxu2  ;;  %v2442_v45 = vld [vmem:[#allocation7 + $0x368] sm:$0xf0]  ;;  %v2417_v25 = vld [vmem:[#allocation7 + $0x2a0] sm:$0xf0] }
  0xb0   :  { %v2754_v6 = vpack.c.bf16 %v219_v61, %v219_v61  ;;  %1096 = vmatpush.bf16.msra.mxu3 %v2140_v57  ;;  %v2041_v57 = vld [vmem:[#allocation7 + $0x2c4] sm:$0xf0]  ;;  %v1724_v61 = vor.u32 %v2339_v53, %v1721_v54  ;;  %v1701_v2 = vld [vmem:[#allocation7 + $0x1c] sm:$0xf0]  ;;  %v2128_v52 = vor.u32 %v2442_v45, %v2127_v44  ;;  %v2392_v54 = vld [vmem:[#allocation7 + $0x1d8] sm:$0xf0] }
  0xb1   :  { %1109 = vmatpush.bf16.msrb.mxu0 %v1824_v62  ;;  %1135 = vmatpush.bf16.msrb.mxu2 %v2144_v63  ;;  %v2019_v62 = vld [vmem:[#allocation7 + $0x288] sm:$0xf]  ;;  %v2416_v63 = vld [vmem:[#allocation7 + $0x298] sm:$0xf0]  ;;  %v2044_v1 = vor.u32 %v2419_v56, %v2041_v57  ;;  %v1704_v14 = vor.u32 %v2334_v0, %v1701_v2  ;;  %v2437_v56 = vld [vmem:[#allocation7 + $0x340] sm:$0xf0] }
  0xb2   :  { %1025 = vmatmul.bf16.vlgmr.msrb.gmra.mxu1 %v2754_v6  ;;  %v2020_v13 = vor.u32 %v2416_v63, %v2019_v62  ;;  %v1927_v53 = vld [vmem:[#allocation7 + $0x1c8] sm:$0xf]  ;;  %v1907_v62 = vld [vmem:[#allocation7 + $0x1a0] sm:$0xf]  ;;  %v2387_v63 = vld [vmem:[#allocation7 + $0x1b0] sm:$0xf0] }
  0xb3   :  { %1121 = vmatpush.bf16.msrb.mxu1 %v2004_v7  ;;  %v1847_v7 = vld [vmem:[#allocation7 + $0x128] sm:$0xf]  ;;  %v1928_v58 = vor.u32 %v2392_v54, %v1927_v53  ;;  %v1908_v3 = vor.u32 %v2387_v63, %v1907_v62  ;;  %v2482_v44 = vld [vmem:[#allocation10 + $0xe8] sm:$0xff]  ;;  %v2472_v54 = vld [vmem:[#allocation10 + $0x98] sm:$0xff] }
  0xb4   :  { %1097 = vmatpush.bf16.msra.mxu3 %v2120_v8  ;;  %v2372_v8 = vld [vmem:[#allocation7 + $0x138] sm:$0xf0]  ;;  %v2087_v0 = vld [vmem:[#allocation7 + $0x308] sm:$0xf]  ;;  %v2470_v62 = vld [vmem:[#allocation10 + $0x88] sm:$0xff] }
  0xb5   :  { %1110 = vmatpush.bf16.msrb.mxu0 %v1804_v11  ;;  %1136 = vmatpush.bf16.msrb.mxu2 %v2124_v12  ;;  %v2379_v11 = vld [vmem:[#allocation7 + $0x174] sm:$0xf]  ;;  %v1881_v12 = vld [vmem:[#allocation7 + $0x184] sm:$0xf0]  ;;  %v1848_v16 = vor.u32 %v2372_v8, %v1847_v7  ;;  %v1887_v8 = vld [vmem:[#allocation7 + $0x178] sm:$0xf] }
  0xb6   :  { %v1884_v18 = vor.u32 %v2379_v11, %v1881_v12  ;;  %v2427_v11 = vld [vmem:[#allocation7 + $0x2f0] sm:$0xf0]  ;;  %v2453_v45 = vld [vmem:[#allocation10] sm:$0xff] }
  0xb7   :  { %1122 = vmatpush.bf16.msrb.mxu1 %v1984_v19  ;;  %v1827_v19 = vld [vmem:[#allocation7 + $0x100] sm:$0xf]  ;;  %v2478_v63 = vld [vmem:[#allocation10 + $0xc8] sm:$0xff] }
  0xb8   :  { %1098 = vmatpush.bf16.msra.mxu3 %v2100_v20  ;;  %v2367_v20 = vld [vmem:[#allocation7 + $0x110] sm:$0xf0] }
  0xb9   :  { %1111 = vmatpush.bf16.msrb.mxu0 %v1784_v23  ;;  %1137 = vmatpush.bf16.msrb.mxu2 %v2104_v24  ;;  %v2374_v23 = vld [vmem:[#allocation7 + $0x14c] sm:$0xf]  ;;  %v1861_v24 = vld [vmem:[#allocation7 + $0x15c] sm:$0xf0]  ;;  %v1828_v27 = vor.u32 %v2367_v20, %v1827_v19  ;;  %v2047_v19 = vld [vmem:[#allocation7 + $0x2b8] sm:$0xf] }
  0xba   :  { %v2422_v20 = vld [vmem:[#allocation7 + $0x2c8] sm:$0xf0] }
  0xbb   :  { %1123 = vmatpush.bf16.msrb.mxu1 %v1964_v29  ;;  %1051 = vmatmul.bf16.vlgmr.msrb.gmra.mxu3 %v2749_v47  ;;  %v1864_v29 = vor.u32 %v2374_v23, %v1861_v24  ;;  %v2048_v23 = vor.u32 %v2422_v20, %v2047_v19  ;;  %v2027_v24 = vld [vmem:[#allocation7 + $0x290] sm:$0xf] }
  0xbc   :  { %1064 = vmatmul.bf16.vlgmr.msra.gmra.mxu0 %v2754_v6  ;;  %1090 = vmatmul.bf16.vlgmr.msra.gmra.mxu2 %v2749_v47  ;;  %v2028_v26 = vor.u32 %v2417_v25, %v2027_v24 }
  0xbd   :  { %1099 = vmatpush.bf16.msra.mxu3 %v2080_v34  ;;  %1112 = vmatpush.bf16.msrb.mxu0 %v1764_v35  ;;  %v2402_v34 = vld [vmem:[#allocation7 + $0x228] sm:$0xf0]  ;;  %v2147_v35 = vld [vmem:[#allocation7 + $0x380] sm:$0xf] }
  0xbe   :  { %1138 = vmatpush.bf16.msrb.mxu2 %v2084_v37  ;;  %v1808_v37 = vor.u32 %v2362_v31, %v1807_v30  ;;  %v1968_v38 = vor.u32 %v2402_v34, %v1967_v33  ;;  %v2467_v30 = vld [vmem:[#allocation10 + $0x70] sm:$0xff]  ;;  %v2458_v31 = vld [vmem:[#allocation10 + $0x28] sm:$0xff]  ;;  %v2457_v33 = vld [vmem:[#allocation10 + $0x20] sm:$0xff] }
  0xbf   :  { %1124 = vmatpush.bf16.msrb.mxu1 %v1944_v41  ;;  %v2148_v41 = vor.u32 %v2447_v36, %v2147_v35  ;;  %v2465_v34 = vld [vmem:[#allocation10 + $0x60] sm:$0xff]  ;;  %v2476_v35 = vld [vmem:[#allocation10 + $0xb8] sm:$0xff]  ;;  %v2455_v36 = vld [vmem:[#allocation10 + $0x10] sm:$0xff] }
  0xc1   :  { %1100 = vmatpush.bf16.msra.mxu3 %v2060_v48  ;;  %1113 = vmatpush.bf16.msrb.mxu0 %v1744_v49  ;;  %v1788_v48 = vor.u32 %v2357_v40, %v1787_v39  ;;  %v1948_v49 = vor.u32 %v2397_v43, %v1947_v42  ;;  %v2483_v39 = vld [vmem:[#allocation10 + $0xf0] sm:$0xff]  ;;  %v2454_v40 = vld [vmem:[#allocation10 + $0x8] sm:$0xff] }
  0xc2   :  { %1139 = vmatpush.bf16.msrb.mxu2 %v2064_v51  ;;  %1077 = vmatmul.bf16.vlgmr.msra.gmra.mxu1 %v2747_v46  ;;  %v2352_v51 = vld [vmem:[#allocation7 + $0x98] sm:$0xf0]  ;;  %v2474_v42 = vld [vmem:[#allocation10 + $0xa8] sm:$0xff] }
  0xc3   :  { %1125 = vmatpush.bf16.msrb.mxu1 %v1924_v55  ;;  %v2107_v55 = vld [vmem:[#allocation7 + $0x330] sm:$0xf]  ;;  %v1768_v57 = vor.u32 %v2352_v51, %v1767_v50  ;;  %v2481_v50 = vld [vmem:[#allocation10 + $0xe0] sm:$0xff] }
  0xc5   :  { %1101 = vmatpush.bf16.msra.mxu3 %v2040_v60  ;;  %1114 = vmatpush.bf16.msrb.mxu0 %v1724_v61  ;;  %v2347_v60 = vld [vmem:[#allocation7 + $0x70] sm:$0xf0]  ;;  %v2108_v61 = vor.u32 %v2437_v56, %v2107_v55  ;;  %v2480_v55 = vld [vmem:[#allocation10 + $0xd8] sm:$0xff] }
  0xc6   :  { %1140 = vmatpush.bf16.msrb.mxu2 %v2044_v1  ;;  %v2432_v1 = vld [vmem:[#allocation7 + $0x318] sm:$0xf0]  ;;  %v1748_v2 = vor.u32 %v2347_v60, %v1747_v59 }
  0xc7   :  { %1126 = vmatpush.bf16.msrb.mxu1 %v1904_v5  ;;  %v2342_v5 = vld [vmem:[#allocation7 + $0x48] sm:$0xf0]  ;;  %v2088_v7 = vor.u32 %v2432_v1, %v2087_v0  ;;  %v1192_v0 = vld [vmem:[#allocation1] sm:$0xff]  ;;  %v1193_v1 = vld [vmem:[#allocation1 + $0x9] sm:$0xff] }
  0xc8   :  { %v1728_v12 = vor.u32 %v2342_v5, %v1727_v4  ;;  %v2477_v4 = vld [vmem:[#allocation10 + $0xc0] sm:$0xff]  ;;  %v2492_v5 = vld [vmem:[#allocation10 + $0x138] sm:$0xff] }
  0xc9   :  { %1102 = vmatpush.bf16.msra.mxu3 %v2020_v13  ;;  %1115 = vmatpush.bf16.msrb.mxu0 %v1704_v14  ;;  %v1888_v13 = vor.u32 %v2382_v9, %v1887_v8  ;;  %v1707_v14 = vld [vmem:[#allocation7 + $0x10] sm:$0xf]  ;;  %v1200_v8 = vpack.i.b16 %v1193_v1, %v1193_v1 }
  0xca   :  { %1141 = vmatpush.bf16.msrb.mxu2 %v2024_v15  ;;  %v2337_v15 = vld [vmem:[#allocation7 + $0x20] sm:$0xf0] }
  0xcb   :  { %1127 = vmatpush.bf16.msrb.mxu1 %v1884_v18  ;;  %v2377_v18 = vld [vmem:[#allocation7 + $0x160] sm:$0xf0]  ;;  %v1708_v21 = vor.u32 %v2337_v15, %v1707_v14 }
  0xcc   :  { %1103 = vmatmul.bf16.vlgmr.msra.gmra.mxu3 %v2754_v6  ;;  %1116 = vmatmul.bf16.vlgmr.msrb.gmra.mxu0 %v2747_v46 }
  0xcd   :  { %1147 = vmatpush.bf16.msrb.mxu3 %v1848_v16  ;;  %1160 = vmatpush.bf16.msra.mxu0 %v2008_v17  ;;  %v2068_v16 = vor.u32 %v2427_v11, %v2067_v10  ;;  %v1867_v17 = vld [vmem:[#allocation7 + $0x150] sm:$0xf]  ;;  %v2491_v11 = vld [vmem:[#allocation10 + $0x130] sm:$0xff] }
  0xce   :  { %1142 = vmatmul.bf16.vlgmr.msrb.gmra.mxu2 %v2754_v6  ;;  %v1868_v22 = vor.u32 %v2377_v18, %v1867_v17  ;;  %v2490_v17 = vld [vmem:[#allocation10 + $0x128] sm:$0xff] }
  0xcf   :  { %1128 = vmatpush.bf16.msrb.mxu1 %v1864_v29  ;;  %v2459_v29 = vld [vmem:[#allocation10 + $0x30] sm:$0xff] }
  0xd1   :  { %1148 = vmatpush.bf16.msrb.mxu3 %v1828_v27  ;;  %1161 = vmatpush.bf16.msra.mxu0 %v1988_v28  ;;  %v2460_v27 = vld [vmem:[#allocation10 + $0x38] sm:$0xff] }
  0xd2   :  { %1129 = vmatmul.bf16.vlgmr.msrb.gmra.mxu1 %v2749_v47  ;;  %v2468_v28 = vld [vmem:[#allocation10 + $0x78] sm:$0xff]  ;;  %1565 = vmatpush.bf16.msra.mxu2 %v2460_v27 }
  0xd3   :  { %1173 = vmatpush.bf16.msra.mxu1 %v2168_v32  ;;  %v2466_v32 = vld [vmem:[#allocation10 + $0x68] sm:$0xff] }
  0xd5   :  { %1149 = vmatpush.bf16.msrb.mxu3 %v1808_v37  ;;  %1162 = vmatpush.bf16.msra.mxu0 %v1968_v38  ;;  %v2463_v37 = vld [vmem:[#allocation10 + $0x50] sm:$0xff] }
  0xd6   :  { %1566 = vmatpush.bf16.msra.mxu2 %v2459_v29  ;;  %v2475_v38 = vld [vmem:[#allocation10 + $0xb0] sm:$0xff] }
  0xd7   :  { %1174 = vmatpush.bf16.msra.mxu1 %v2148_v41  ;;  %v2462_v41 = vld [vmem:[#allocation10 + $0x48] sm:$0xff] }
  0xd9   :  { %1150 = vmatpush.bf16.msrb.mxu3 %v1788_v48  ;;  %1163 = vmatpush.bf16.msra.mxu0 %v1948_v49  ;;  %v2461_v48 = vld [vmem:[#allocation10 + $0x40] sm:$0xff] }
  0xda   :  { %1567 = vmatpush.bf16.msra.mxu2 %v2458_v31  ;;  %v2473_v49 = vld [vmem:[#allocation10 + $0xa0] sm:$0xff] }
  0xdb   :  { %1175 = vmatpush.bf16.msra.mxu1 %v2128_v52  ;;  %v2489_v31 = vld [vmem:[#allocation10 + $0x120] sm:$0xff] }
  0xdd   :  { %1151 = vmatpush.bf16.msrb.mxu3 %v1768_v57  ;;  %1164 = vmatpush.bf16.msra.mxu0 %v1928_v58  ;;  %v2471_v57 = vld [vmem:[#allocation10 + $0x90] sm:$0xff] }
  0xde   :  { %1568 = vmatpush.bf16.msra.mxu2 %v2457_v33  ;;  %v2479_v58 = vld [vmem:[#allocation10 + $0xd0] sm:$0xff] }
  0xdf   :  { %1176 = vmatpush.bf16.msra.mxu1 %v2108_v61 }
  0xe1   :  { %1152 = vmatpush.bf16.msrb.mxu3 %v1748_v2  ;;  %1165 = vmatpush.bf16.msra.mxu0 %v1908_v3  ;;  %v2469_v3 = vld [vmem:[#allocation10 + $0x80] sm:$0xff] }
  0xe3   :  { %1177 = vmatpush.bf16.msra.mxu1 %v2088_v7  ;;  %v1197_v7 = vpack.i.b16 %v1192_v0, %v1192_v0 }
  0xe5   :  { %1153 = vmatpush.bf16.msrb.mxu3 %v1728_v12  ;;  %1166 = vmatpush.bf16.msra.mxu0 %v1888_v13  ;;  %v1199_v15 = vperm.slane %v1197_v7, 0 }
  0xe7   :  { %1178 = vmatpush.bf16.msra.mxu1 %v2068_v16  ;;  %v1202_v16 = vperm.slane %v1200_v8, 0 }
  0xe9   :  { %1154 = vmatpush.bf16.msrb.mxu3 %v1708_v21  ;;  %1167 = vmatpush.bf16.msra.mxu0 %v1868_v22  ;;  %v1217_v22 = vunpack.c.l.bf16 %v1199_v15 }
  0xeb   :  { %1179 = vmatpush.bf16.msra.mxu1 %v2048_v23  ;;  %v1218_v23 = vunpack.c.l.bf16 %v1202_v16 }
  0xec   :  { %1155 = vmatmul.bf16.vlgmr.msrb.gmra.mxu3 %v2747_v46  ;;  %1168 = vmatmul.bf16.vlgmr.msra.gmra.mxu0 %v2749_v47  ;;  %v2456_v46 = vld [vmem:[#allocation10 + $0x18] sm:$0xff] }
  0xed   :  { %1578 = vmatpush.bf16.msra.mxu3 %v2468_v28  ;;  %v2464_v47 = vld [vmem:[#allocation10 + $0x58] sm:$0xff]  ;;  %1569 = vmatpush.bf16.msra.mxu2 %v2456_v46  ;;  %v1194_v46 = vld [vmem:[#allocation1 + $0x12] sm:$0xff] }
  0xee   :  { %1591 = vmatpush.bf16.msrb.mxu0 %v2476_v35 }
  0xef   :  { %1180 = vmatpush.bf16.msra.mxu1 %v2028_v26 }
  0xf1   :  { %1579 = vmatpush.bf16.msra.mxu3 %v2467_v30  ;;  %1570 = vmatpush.bf16.msra.mxu2 %v2455_v36  ;;  %v2488_v36 = vld [vmem:[#allocation10 + $0x118] sm:$0xff] }
  0xf2   :  { %1181 = vmatmul.bf16.vlgmr.msra.gmra.mxu1 %v2754_v6  ;;  %v2484_v6 = vld [vmem:[#allocation10 + $0xf8] sm:$0xff]  ;;  %1592 = vmatpush.bf16.msrb.mxu0 %v2475_v38 }
  0xf3   :  { %1604 = vmatpush.bf16.msrb.mxu1 %v2484_v6 }
  0xf5   :  { %1580 = vmatpush.bf16.msra.mxu3 %v2466_v32  ;;  %1571 = vmatpush.bf16.msra.mxu2 %v2454_v40 }
  0xf6   :  { %1593 = vmatpush.bf16.msrb.mxu0 %v2474_v42 }
  0xf7   :  { %1605 = vmatpush.bf16.msrb.mxu1 %v2483_v39 }
  0xf9   :  { %1581 = vmatpush.bf16.msra.mxu3 %v2465_v34  ;;  %1572 = vmatpush.bf16.msra.mxu2 %v2453_v45 }
  0xfa   :  { %1594 = vmatpush.bf16.msrb.mxu0 %v2473_v49 }
  0xfb   :  { %1606 = vmatpush.bf16.msrb.mxu1 %v2482_v44 }
  0xfd   :  { %1582 = vmatpush.bf16.msra.mxu3 %v2464_v47  ;;  %1617 = vmatpush.bf16.msrb.mxu2 %v2492_v5  ;;  %v1195_v47 = vld [vmem:[#allocation1 + $0x1b] sm:$0xff] }
  0xfe   :  { %1595 = vmatpush.bf16.msrb.mxu0 %v2472_v54  ;;  %v1206_v38 = vpack.i.b16 %v1195_v47, %v1195_v47 }
  0xff   :  { %1607 = vmatpush.bf16.msrb.mxu1 %v2481_v50 }
 0x101   :  { %1583 = vmatpush.bf16.msra.mxu3 %v2463_v37  ;;  %1618 = vmatpush.bf16.msrb.mxu2 %v2491_v11  ;;  %v1203_v37 = vpack.i.b16 %v1194_v46, %v1194_v46 }
 0x102   :  { %1596 = vmatpush.bf16.msrb.mxu0 %v2471_v57 }
 0x103   :  { %1608 = vmatpush.bf16.msrb.mxu1 %v2480_v55  ;;  %v1205_v45 = vperm.slane %v1203_v37, 0 }
 0x105   :  { %1584 = vmatpush.bf16.msra.mxu3 %v2462_v41  ;;  %1619 = vmatpush.bf16.msrb.mxu2 %v2490_v17  ;;  %v2487_v41 = vld [vmem:[#allocation10 + $0x110] sm:$0xff]  ;;  %v1219_v54 = vunpack.c.l.bf16 %v1205_v45  ;;  %v2506_v45 = vld [vmem:[%s2787_s7] ss:$0 sm:$0xff] }
 0x106   :  { %1597 = vmatpush.bf16.msrb.mxu0 %v2470_v62 }
 0x107   :  { %1609 = vmatpush.bf16.msrb.mxu1 %v2479_v58 }
 0x109   :  { %1585 = vmatpush.bf16.msra.mxu3 %v2461_v48  ;;  %1620 = vmatpush.bf16.msrb.mxu2 %v2489_v31  ;;  %v1208_v48 = vperm.slane %v1206_v38, 0 }
 0x10a   :  { %1598 = vmatpush.bf16.msrb.mxu0 %v2469_v3 }
 0x10b   :  { %1610 = vmatpush.bf16.msrb.mxu1 %v2478_v63  ;;  %v1220_v55 = vunpack.c.l.bf16 %v1208_v48 }
 0x10d   :  { %1621 = vmatpush.bf16.msrb.mxu2 %v2488_v36 }
 0x10f   :  { %1611 = vmatpush.bf16.msrb.mxu1 %v2477_v4  ;;  %v1196_v4 = vld [vmem:[#allocation1 + $0x24] sm:$0xff] }
 0x110   :  { %v1209_v7 = vpack.i.b16 %v1196_v4, %v1196_v4 }
 0x111   :  { %1622 = vmatpush.bf16.msrb.mxu2 %v2487_v41 }
 0x112   :  { %v1211_v11 = vperm.slane %v1209_v7, 0 }
 0x114   :  { %v1221_v15 = vunpack.c.l.bf16 %v1211_v11 }
 0x128   :  { %v1013_v43 = vpop.f32.mrf.mxu0 }
 0x12e   :  { %v1000_v51 = vpop.f32.mrf.mxu3 }
 0x12f   :  { %v1026_v52 = vpop.f32.mrf.mxu1  ;;  %v1039_v53 = vpop.f32.mrf.mxu2  ;;  %v1014_v9 = vadd.f32 %v1013_v43, %v1000_v51 }
 0x130   :  { %v1015_v56 = vpop.f32.mrf.mxu0 }
 0x131   :  { %v1027_v18 = vadd.f32 %v1026_v52, %v1014_v9  ;;  %v2486_v52 = vld [vmem:[#allocation10 + $0x108] sm:$0xff] }
 0x132   :  { %1623 = vmatpush.bf16.msrb.mxu2 %v2486_v52 }
 0x136   :  { %v1002_v59 = vpop.f32.mrf.mxu3 }
 0x137   :  { %v1028_v60 = vpop.f32.mrf.mxu1  ;;  %v1041_v61 = vpop.f32.mrf.mxu2 }
 0x138   :  { %v2485_v60 = vld [vmem:[#allocation10 + $0x100] sm:$0xff] }
 0x139   :  { %v1065_v2 = vpop.f32.mrf.mxu0  ;;  %1624 = vmatpush.bf16.msrb.mxu2 %v2485_v60 }
 0x13e   :  { %v1052_v10 = vpop.f32.mrf.mxu3 }
 0x13f   :  { %v1053_v12 = vadd.f32 %v1052_v10, %v1039_v53  ;;  %v1078_v13 = vpop.f32.mrf.mxu1  ;;  %v1091_v14 = vpop.f32.mrf.mxu2 }
 0x140   :  { %v1092_v42 = vadd.f32 %v1091_v14, %v1078_v13 }
 0x141   :  { %v1066_v19 = vadd.f32 %v1065_v2, %v1053_v12  ;;  %v1067_v20 = vpop.f32.mrf.mxu0 }
 0x143   :  { %v1186_v21 = vpack.c.bf16 %v1066_v19, %v1027_v18 }
 0x145   :  { %v1212_v24 = vunpack.c.l.bf16 %v1186_v21  ;;  %v1213_v25 = vunpack.c.h.bf16 %v1186_v21 }
 0x146   :  { %v1054_v26 = vpop.f32.mrf.mxu3 }
 0x147   :  { %v1080_v27 = vpop.f32.mrf.mxu1  ;;  %v1093_v28 = vpop.f32.mrf.mxu2  ;;  %v1222_v29 = vadd.f32 %v1217_v22, %v1212_v24  ;;  %v1223_v30 = vadd.f32 %v1218_v23, %v1213_v25 }
 0x149   :  { %v1117_v32 = vpop.f32.mrf.mxu0  ;;  %v1235_v33 = vmax.f32 %v1222_v29, 0.0  ;;  %v1236_v34 = vmax.f32 %v1223_v30, 0.0 }
 0x14b   :  { %v1240_v35 = vpack.c.bf16 %v1235_v33, %v1235_v33  ;;  %v1241_v6 = vpack.c.bf16 %v1236_v34, %v1236_v34  ;;  %v2505_v33 = vld [vmem:[%s2786_s6] ss:$0 sm:$0xff] }
 0x14d   :  { %1573 = vmatmul.bf16.vlgmr.msra.gmra.mxu2 %v1240_v35  ;;  %1586 = vmatmul.bf16.vlgmr.msra.gmra.mxu3 %v1241_v6 }
 0x14f   :  { %v1104_v39 = vpop.f32.mrf.mxu3  ;;  %v1130_v40 = vpop.f32.mrf.mxu1 }
 0x150   :  { %v1131_v43 = vadd.f32 %v1130_v40, %v1117_v32  ;;  %v1105_v50 = vadd.f32 %v1104_v39, %v1092_v42 }
 0x151   :  { %v1143_v44 = vpop.f32.mrf.mxu2  ;;  %v1119_v49 = vpop.f32.mrf.mxu0 }
 0x152   :  { %v1144_v51 = vadd.f32 %v1143_v44, %v1131_v43 }
 0x154   :  { %v1187_v53 = vpack.c.bf16 %v1144_v51, %v1105_v50  ;;  %v2507_v50 = vld [vmem:[%s2788_s8] ss:$0 sm:$0xff] }
 0x156   :  { %v1214_v56 = vunpack.c.l.bf16 %v1187_v53  ;;  %v1215_v57 = vunpack.c.h.bf16 %v1187_v53 }
 0x157   :  { %v1106_v58 = vpop.f32.mrf.mxu3  ;;  %v1132_v59 = vpop.f32.mrf.mxu1 }
 0x158   :  { %v1224_v61 = vadd.f32 %v1219_v54, %v1214_v56  ;;  %v1225_v62 = vadd.f32 %v1220_v55, %v1215_v57 }
 0x159   :  { %v1145_v63 = vpop.f32.mrf.mxu2 }
 0x15a   :  { %v1237_v0 = vmax.f32 %v1224_v61, 0.0  ;;  %v1238_v1 = vmax.f32 %v1225_v62, 0.0 }
 0x15c   :  { %v1242_v2 = vpack.c.bf16 %v1237_v0, %v1237_v0  ;;  %v1243_v3 = vpack.c.bf16 %v1238_v1, %v1238_v1 }
 0x15e   :  { %1599 = vmatmul.bf16.vlgmr.msrb.gmra.mxu0 %v1242_v2  ;;  %1612 = vmatmul.bf16.vlgmr.msrb.gmra.mxu1 %v1243_v3 }
 0x169   :  { %v1169_v5 = vpop.f32.mrf.mxu0 }
 0x16f   :  { %v1156_v8 = vpop.f32.mrf.mxu3  ;;  %v1182_v9 = vpop.f32.mrf.mxu1 }
 0x170   :  { %v1170_v10 = vadd.f32 %v1169_v5, %v1156_v8 }
 0x171   :  { %v1171_v13 = vpop.f32.mrf.mxu0 }
 0x172   :  { %v1183_v12 = vadd.f32 %v1182_v9, %v1170_v10 }
 0x174   :  { %v1188_v14 = vpack.c.bf16 %v1183_v12, %v1183_v12 }
 0x176   :  { %v1216_v16 = vunpack.c.l.bf16 %v1188_v14 }
 0x177   :  { %v1158_v17 = vpop.f32.mrf.mxu3  ;;  %v1184_v18 = vpop.f32.mrf.mxu1 }
 0x178   :  { %v1226_v19 = vadd.f32 %v1221_v15, %v1216_v16 }
 0x17a   :  { %v1239_v20 = vmax.f32 %v1226_v19, 0.0 }
 0x17c   :  { %v1244_v21 = vpack.c.bf16 %v1239_v20, %v1239_v20 }
 0x17e   :  { %1625 = vmatmul.bf16.vlgmr.msrb.gmra.mxu2 %v1244_v21 }
 0x1d0   :  { %v1574_v22 = vpop.f32.mrf.mxu2  ;;  %v1587_v23 = vpop.f32.mrf.mxu3 }
 0x1d1   :  { %v1588_v30 = vadd.f32 %v1587_v23, %v1574_v22 }
 0x1d8   :  { %v1576_v24 = vpop.f32.mrf.mxu2  ;;  %v1589_v25 = vpop.f32.mrf.mxu3 }
 0x1db   :  { %v1600_v26 = vpop.f32.mrf.mxu0  ;;  %v1613_v27 = vpop.f32.mrf.mxu1 }
 0x1dc   :  { %v1601_v31 = vadd.f32 %v1600_v26, %v1588_v30 }
 0x1de   :  { %v1614_v32 = vadd.f32 %v1613_v27, %v1601_v31 }
 0x1e3   :  { %v1602_v28 = vpop.f32.mrf.mxu0  ;;  %v1615_v29 = vpop.f32.mrf.mxu1 }
 0x201   :  { %v1626_v34 = vpop.f32.mrf.mxu2 }
 0x202   :  { %v1627_v46 = vadd.f32 %v1626_v34, %v1614_v32 }
 0x204   :  { %v1634_v47 = vadd.f32 %v2505_v33, %v1627_v46 }
 0x206   :  { %v2329_v35 = vmul.f32 -1.442695, %v1634_v47 }
 0x208   :  { %2508 = vpow2.f32 %v2329_v35 }
 0x209   :  { %v1628_v6 = vpop.f32.mrf.mxu2 }
 0x20e   :  { %v2509_v36 = vpop.eup %2508 }
 0x20f   :  { %v1638_v37 = vadd.f32 1.0, %v2509_v36 }
 0x211   :  { %2510 = vrcp.f32 %v1638_v37  ;;  %v1650_v41 = vand.u32 2147483648, %v1638_v37  ;;  %v1648_v43 = vand.u32 2147483647, %v1638_v37  ;;  %vm1644_vm2 = vweird.f32 %v1638_v37 }
 0x213   :  { %v1651_v48 = vor.u32 1.1754944e-38, %v1650_v41  ;;  %vm1649_vm4 = vcmp.eq.f32.partialorder %v1648_v43, 8.507059e+37 }
 0x217   :  { %v2511_v38 = vpop.eup %2510 }
 0x218   :  { %v1640_v39 = vmul.f32 %v2511_v38, %v1638_v37  ;;  %vm1645_vm1 = vweird.f32 %v2511_v38 }
 0x219   :  { %vm1646_vm3 = vmor %vm1644_vm2, %vm1645_vm1 }
 0x21a   :  { %v1641_v40 = vsub.f32 1.0, %v1640_v39 }
 0x21c   :  { %v1642_v42 = vmul.f32 %v2511_v38, %v1641_v40 }
 0x21e   :  { %v1643_v44 = vadd.f32 %v2511_v38, %v1642_v42 }
 0x220   :  { %v1647_v49 = vsel %vm1646_vm3, %v2511_v38, %v1643_v44 }
 0x221   :  { %v1652_v51 = vsel %vm1649_vm4, %v1651_v48, %v1647_v49 }
 0x222   :  { %v1658_v52 = vmul.f32 %v2506_v45, %v1652_v51 }
 0x224   :  { %v1663_v53 = vadd.f32 %v2507_v50, %v1658_v52 }
 0x226   :  { %1665 = vst.msk [vmem:[%s2789_s9] sm:$0xff] %vm1664_vm5, %v1663_v53 }
 0x227   :  { %1670 = vsyncpa [#allocation3], 1 }
 0x228   :  { %1671 = vsyncpa [#allocation5], 1 }
 0x229   :  { %1672 = vsyncpa [#allocation8], 1 }
 0x22a   :  { %1673 = vsyncpa [#allocation11], 1 }

</bundles_post_ra>
